<compile_context>
chip_gen: v6e
topology: v6e:2x2x1
jax: 0.10.0
libtpu: 0.0.40
codegen_flags: <defaults>
</compile_context>

<pallas_src>
import jax
import jax.numpy as jnp
from jax.experimental import pallas as pl
from jax.experimental.pallas import tpu as pltpu


def _round_up(n, m):
    return ((n + m - 1) // m) * m


def _pad2(a, rows, cols):
    return jnp.pad(a, ((0, rows - a.shape[0]), (0, cols - a.shape[1])))


def _physical_vmem_bytes():
    """Per-TensorCore VMEM capacity; conservative (v7x) fallback if unknown."""
    try:
        return int(pltpu.get_tpu_info().vmem_capacity_bytes)
    except Exception:
        return 64 << 20


def residual_block_kernel(x_ref, w1_ref, c1_ref, w2_ref, c2_ref,
                          wsk_ref, csk_ref, o_ref):
    """One batch tile: fused (Linear+BN+ReLU) x2 plus skip Linear + residual add."""
    x = x_ref[...]                                                   # (TM, F_in_p) bf16

    # main branch: Linear1 (+ folded BN1) -> ReLU -> Dropout (identity in eval)
    h = jnp.dot(x, w1_ref[...], preferred_element_type=jnp.float32) + c1_ref[...]
    h = jnp.maximum(h, 0.0)
    # TODO(synk): training-mode dropout would need pltpu.prng_seed / prng_random_bits.

    # main branch: Linear2 (+ folded BN2) -> ReLU -> Dropout (identity in eval)
    # bf16 intermediate for the MXU (f32 accumulation); documented precision tradeoff.
    h = jnp.dot(h.astype(jnp.bfloat16), w2_ref[...],
                preferred_element_type=jnp.float32) + c2_ref[...]
    h = jnp.maximum(h, 0.0)

    # skip branch: Linear (in_features != out_features case)
    skip = jnp.dot(x, wsk_ref[...], preferred_element_type=jnp.float32) + csk_ref[...]

    o_ref[...] = (h + skip).astype(o_ref.dtype)


def residual_block(x, params, *, max_batch_tile=512, out_dtype=jnp.float32,
                   return_padded=False):
    """x: (B, F_in) float32.  params: dict of weights (see init_params).

    out_dtype=jnp.bfloat16 halves output HBM traffic if the consumer tolerates it.
    return_padded=True skips the post-kernel slice (keeps the (B_p, F_out_p) slab).
    """
    B, F_in = x.shape
    F_out = params["w1"].shape[1]
    eps = 1e-5
    out_dtype = jnp.dtype(out_dtype)
    out_itemsize = out_dtype.itemsize

    # ---- Fold BatchNorm1d (eval mode) into the weights and a single bias (f32) ----
    s1 = params["bn1_gamma"] / jnp.sqrt(params["bn1_var"] + eps)
    w1f = params["w1"] * s1[None, :]
    c1 = (params["b1"] - params["bn1_mean"]) * s1 + params["bn1_beta"]
    s2 = params["bn2_gamma"] / jnp.sqrt(params["bn2_var"] + eps)
    w2f = params["w2"] * s2[None, :]
    c2 = (params["b2"] - params["bn2_mean"]) * s2 + params["bn2_beta"]

    # ---- Pad feature dims to lane multiples (128) ----
    F_in_p = _round_up(F_in, 128)
    F_out_p = _round_up(F_out, 128)

    # ---- VMEM accounting ----
    # Resident (single-buffered) bf16 weights + f32 bias rows.
    weight_bytes = 2 * (F_in_p * F_out_p + F_out_p * F_out_p + F_in_p * F_out_p) \
        + 4 * 3 * F_out_p
    phys_vmem = _physical_vmem_bytes()
    usable_vmem = phys_vmem - (8 << 20)        # headroom for compiler scratch

    def tile_vmem(tm):
        return (2 * (2 * tm * F_in_p)                  # x tile, bf16, double-buffered
                + 2 * (out_itemsize * tm * F_out_p)    # out tile, double-buffered
                + 8 * tm * F_out_p)                    # f32 h + skip intermediates

    # ---- Batch tile: multiple of 16 (bf16 sublane packing), >=2 grid steps
    #      when B allows (v7x megacore), shrink if VMEM-tight. ----
    TM = max(16, _round_up(min(max_batch_tile, _round_up(B, 16)), 16))
    while TM > 16 and _round_up(B, TM) // TM < 2:
        TM = max(16, _round_up(TM // 2, 16))
    while TM > 16 and weight_bytes + tile_vmem(TM) > usable_vmem:
        TM = max(16, _round_up(TM // 2, 16))

    B_p = _round_up(B, TM)
    grid = (B_p // TM,)

    x_p = _pad2(x, B_p, F_in_p).astype(jnp.bfloat16)
    w1_p = _pad2(w1f, F_in_p, F_out_p).astype(jnp.bfloat16)
    w2_p = _pad2(w2f, F_out_p, F_out_p).astype(jnp.bfloat16)
    wsk_p = _pad2(params["wsk"], F_in_p, F_out_p).astype(jnp.bfloat16)

    def row(v):  # per-feature vector as (1, F_out_p) f32 (added post-accumulation)
        return jnp.pad(v, (0, F_out_p - v.shape[0])).reshape(1, F_out_p).astype(jnp.float32)

    c1_p, c2_p, csk_p = row(c1), row(c2), row(params["bsk"])

    vmem_limit = int(min(max(weight_bytes + tile_vmem(TM) + (4 << 20), 32 << 20),
                         usable_vmem))

    flops = 2 * B_p * F_out_p * (2 * F_in_p + F_out_p)   # two in->out matmuls + out->out
    bytes_accessed = int(2 * B_p * F_in_p + weight_bytes + out_itemsize * B_p * F_out_p)

    def resident(shape):
        # Constant index_map -> block fetched once; Buffered(1) drops the default
        # second buffer so resident weight VMEM is halved (key for v7x's 64 MiB).
        return pl.BlockSpec(shape, lambda i: (0, 0), pipeline_mode=pl.Buffered(1))

    out = pl.pallas_call(
        residual_block_kernel,
        out_shape=jax.ShapeDtypeStruct((B_p, F_out_p), out_dtype),
        grid=grid,
        in_specs=[
            pl.BlockSpec((TM, F_in_p), lambda i: (i, 0)),    # x batch tile (pipelined)
            resident((F_in_p, F_out_p)),                     # w1 (BN1-folded)
            resident((1, F_out_p)),                          # c1
            resident((F_out_p, F_out_p)),                    # w2 (BN2-folded)
            resident((1, F_out_p)),                          # c2
            resident((F_in_p, F_out_p)),                     # skip weight
            resident((1, F_out_p)),                          # skip bias
        ],
        out_specs=pl.BlockSpec((TM, F_out_p), lambda i: (i, 0)),
        compiler_params=pltpu.CompilerParams(
            dimension_semantics=("parallel",),
            vmem_limit_bytes=vmem_limit),
        cost_estimate=pl.CostEstimate(
            flops=flops, transcendentals=0, bytes_accessed=bytes_accessed),
    )(x_p, w1_p, c1_p, w2_p, c2_p, wsk_p, csk_p)

    # TODO(synk): for very large F (resident bf16 weights > ~48 MiB even after
    # Buffered(1)), add an "arbitrary" grid axis N-tiling w2/wsk columns (h kept
    # in a VMEM scratch computed at n==0) so the fused kernel still fits v7x.

    if return_padded or (B == B_p and F_out == F_out_p):
        return out
    return out[:B, :F_out]


def init_params(key, in_features, out_features):
    """Deterministic synthetic parameters (shapes match the PyTorch module)."""
    ks = jax.random.split(key, 10)
    lim1 = 1.0 / jnp.sqrt(in_features)
    lim2 = 1.0 / jnp.sqrt(out_features)
    return {
        # nn.Linear(in_features, out_features) -> stored transposed: (in, out)
        "w1": jax.random.uniform(ks[0], (in_features, out_features), jnp.float32, -lim1, lim1),
        "b1": jax.random.uniform(ks[1], (out_features,), jnp.float32, -lim1, lim1),
        # nn.BatchNorm1d(out_features)
        "bn1_gamma": jnp.ones((out_features,), jnp.float32),
        "bn1_beta": jnp.zeros((out_features,), jnp.float32),
        "bn1_mean": 0.1 * jax.random.normal(ks[2], (out_features,), jnp.float32),
        "bn1_var": jnp.abs(jax.random.normal(ks[3], (out_features,), jnp.float32)) + 0.5,
        # nn.Linear(out_features, out_features)
        "w2": jax.random.uniform(ks[4], (out_features, out_features), jnp.float32, -lim2, lim2),
        "b2": jax.random.uniform(ks[5], (out_features,), jnp.float32, -lim2, lim2),
        # nn.BatchNorm1d(out_features)
        "bn2_gamma": jnp.ones((out_features,), jnp.float32),
        "bn2_beta": jnp.zeros((out_features,), jnp.float32),
        "bn2_mean": 0.1 * jax.random.normal(ks[6], (out_features,), jnp.float32),
        "bn2_var": jnp.abs(jax.random.normal(ks[7], (out_features,), jnp.float32)) + 0.5,
        # skip: nn.Linear(in_features, out_features)  (in_features != out_features)
        "wsk": jax.random.uniform(ks[8], (in_features, out_features), jnp.float32, -lim1, lim1),
        "bsk": jax.random.uniform(ks[9], (out_features,), jnp.float32, -lim1, lim1),
    }


def residual_block_ref(x, params):
    """Pure-JAX f32 reference (eval-mode semantics)."""
    eps = 1e-5
    h = x @ params["w1"] + params["b1"]
    h = (h - params["bn1_mean"]) / jnp.sqrt(params["bn1_var"] + eps) \
        * params["bn1_gamma"] + params["bn1_beta"]
    h = jnp.maximum(h, 0.0)
    h = h @ params["w2"] + params["b2"]
    h = (h - params["bn2_mean"]) / jnp.sqrt(params["bn2_var"] + eps) \
        * params["bn2_gamma"] + params["bn2_beta"]
    h = jnp.maximum(h, 0.0)
    skip = x @ params["wsk"] + params["bsk"]
    return h + skip


if __name__ == "__main__":
    B, F_IN, F_OUT = 8, 16, 32
    key = jax.random.PRNGKey(0)
    kx, kp = jax.random.split(key)

    x = jax.random.normal(kx, (B, F_IN), jnp.float32)
    params = init_params(kp, F_IN, F_OUT)

    out = residual_block(x, params)
    out = jax.block_until_ready(out)

    ref = residual_block_ref(x, params)
    assert out.shape == (B, F_OUT)
    # bf16 matmul operands (f32 accumulate) vs an all-f32 reference -> loosened tol.
    assert jnp.allclose(out, ref, atol=5e-2, rtol=5e-2), (
        f"mismatch vs reference, max abs err = {jnp.max(jnp.abs(out - ref))}")

    print("KERNEL_OK")
</pallas_src>

<mosaic_0001>
module attributes {stable_mosaic.version = 11 : i64} {
  func.func @residual_block_kernel(%arg0: i32, %arg1: memref<16x128xbf16, #tpu.memory_space<vmem>>, %arg2: memref<128x128xbf16, #tpu.memory_space<vmem>>, %arg3: memref<1x128xf32, #tpu.memory_space<vmem>>, %arg4: memref<128x128xbf16, #tpu.memory_space<vmem>>, %arg5: memref<1x128xf32, #tpu.memory_space<vmem>>, %arg6: memref<128x128xbf16, #tpu.memory_space<vmem>>, %arg7: memref<1x128xf32, #tpu.memory_space<vmem>>, %arg8: memref<16x128xf32, #tpu.memory_space<vmem>>) attributes {dimension_semantics = [#tpu.dimension_semantics<parallel>], iteration_bounds = array<i64: 1>, scalar_prefetch = 0 : i64, scratch_operands = 0 : i64, tpu.core_type = #tpu.core_type<tc>, window_params = [{transform_indices = @transform_0, window_bounds = array<i64: 16, 128>}, {pipeline_mode = #tpu.pipeline_mode<synchronous>, transform_indices = @transform_1, window_bounds = array<i64: 128, 128>}, {pipeline_mode = #tpu.pipeline_mode<synchronous>, transform_indices = @transform_2, window_bounds = array<i64: 1, 128>}, {pipeline_mode = #tpu.pipeline_mode<synchronous>, transform_indices = @transform_3, window_bounds = array<i64: 128, 128>}, {pipeline_mode = #tpu.pipeline_mode<synchronous>, transform_indices = @transform_4, window_bounds = array<i64: 1, 128>}, {pipeline_mode = #tpu.pipeline_mode<synchronous>, transform_indices = @transform_5, window_bounds = array<i64: 128, 128>}, {pipeline_mode = #tpu.pipeline_mode<synchronous>, transform_indices = @transform_6, window_bounds = array<i64: 1, 128>}, {transform_indices = @transform_7, window_bounds = array<i64: 16, 128>}]} {
    %c0 = arith.constant 0 : index
    %c0_0 = arith.constant 0 : index
    %0 = vector.load %arg1[%c0, %c0_0] : memref<16x128xbf16, #tpu.memory_space<vmem>>, vector<16x128xbf16>
    %c0_1 = arith.constant 0 : index
    %c0_2 = arith.constant 0 : index
    %1 = vector.load %arg2[%c0_1, %c0_2] : memref<128x128xbf16, #tpu.memory_space<vmem>>, vector<128x128xbf16>
    %cst = arith.constant dense<0.000000e+00> : vector<16x128xf32>
    %2 = tpu.matmul %0, %1, %cst {dimension_numbers = #tpu.dot_dimension_numbers<[1], [0], [0], [1], [0, 0, 1, 1], [], []>} : vector<16x128xbf16>, vector<128x128xbf16>, vector<16x128xf32> -> vector<16x128xf32>
    %c0_3 = arith.constant 0 : index
    %c0_4 = arith.constant 0 : index
    %3 = vector.load %arg3[%c0_3, %c0_4] : memref<1x128xf32, #tpu.memory_space<vmem>>, vector<1x128xf32>
    %4 = vector.broadcast %3 : vector<1x128xf32> to vector<16x128xf32>
    %5 = arith.addf %2, %4 : vector<16x128xf32>
    %cst_5 = arith.constant 0.000000e+00 : f32
    %6 = vector.broadcast %cst_5 : f32 to vector<16x128xf32>
    %7 = arith.maximumf %5, %6 : vector<16x128xf32>
    %8 = arith.truncf %7 : vector<16x128xf32> to vector<16x128xbf16>
    %c0_6 = arith.constant 0 : index
    %c0_7 = arith.constant 0 : index
    %9 = vector.load %arg4[%c0_6, %c0_7] : memref<128x128xbf16, #tpu.memory_space<vmem>>, vector<128x128xbf16>
    %cst_8 = arith.constant dense<0.000000e+00> : vector<16x128xf32>
    %10 = tpu.matmul %8, %9, %cst_8 {dimension_numbers = #tpu.dot_dimension_numbers<[1], [0], [0], [1], [0, 0, 1, 1], [], []>} : vector<16x128xbf16>, vector<128x128xbf16>, vector<16x128xf32> -> vector<16x128xf32>
    %c0_9 = arith.constant 0 : index
    %c0_10 = arith.constant 0 : index
    %11 = vector.load %arg5[%c0_9, %c0_10] : memref<1x128xf32, #tpu.memory_space<vmem>>, vector<1x128xf32>
    %12 = vector.broadcast %11 : vector<1x128xf32> to vector<16x128xf32>
    %13 = arith.addf %10, %12 : vector<16x128xf32>
    %cst_11 = arith.constant 0.000000e+00 : f32
    %14 = vector.broadcast %cst_11 : f32 to vector<16x128xf32>
    %15 = arith.maximumf %13, %14 : vector<16x128xf32>
    %c0_12 = arith.constant 0 : index
    %c0_13 = arith.constant 0 : index
    %16 = vector.load %arg6[%c0_12, %c0_13] : memref<128x128xbf16, #tpu.memory_space<vmem>>, vector<128x128xbf16>
    %cst_14 = arith.constant dense<0.000000e+00> : vector<16x128xf32>
    %17 = tpu.matmul %0, %16, %cst_14 {dimension_numbers = #tpu.dot_dimension_numbers<[1], [0], [0], [1], [0, 0, 1, 1], [], []>} : vector<16x128xbf16>, vector<128x128xbf16>, vector<16x128xf32> -> vector<16x128xf32>
    %c0_15 = arith.constant 0 : index
    %c0_16 = arith.constant 0 : index
    %18 = vector.load %arg7[%c0_15, %c0_16] : memref<1x128xf32, #tpu.memory_space<vmem>>, vector<1x128xf32>
    %19 = vector.broadcast %18 : vector<1x128xf32> to vector<16x128xf32>
    %20 = arith.addf %17, %19 : vector<16x128xf32>
    %21 = arith.addf %15, %20 : vector<16x128xf32>
    %c0_17 = arith.constant 0 : index
    %c0_18 = arith.constant 0 : index
    %22 = vector.load %arg8[%c0_17, %c0_18] : memref<16x128xf32, #tpu.memory_space<vmem>>, vector<16x128xf32>
    tpu.vector_store %arg8[%c0_17, %c0_18], %21 {strides = array<i32>} : memref<16x128xf32, #tpu.memory_space<vmem>>, vector<16x128xf32>,
    return
  }
  func.func @transform_0(%arg0: i32) -> (i32, i32) {
    %c0_i32 = arith.constant 0 : i32
    %c0_i32_0 = arith.constant 0 : i32
    return %arg0, %c0_i32 : i32, i32
  }
  func.func @transform_1(%arg0: i32) -> (i32, i32) {
    %c0_i32 = arith.constant 0 : i32
    %c0_i32_0 = arith.constant 0 : i32
    %c0_i32_1 = arith.constant 0 : i32
    return %c0_i32, %c0_i32_0 : i32, i32
  }
  func.func @transform_2(%arg0: i32) -> (i32, i32) {
    %c0_i32 = arith.constant 0 : i32
    %c0_i32_0 = arith.constant 0 : i32
    %c0_i32_1 = arith.constant 0 : i32
    return %c0_i32, %c0_i32_0 : i32, i32
  }
  func.func @transform_3(%arg0: i32) -> (i32, i32) {
    %c0_i32 = arith.constant 0 : i32
    %c0_i32_0 = arith.constant 0 : i32
    %c0_i32_1 = arith.constant 0 : i32
    return %c0_i32, %c0_i32_0 : i32, i32
  }
  func.func @transform_4(%arg0: i32) -> (i32, i32) {
    %c0_i32 = arith.constant 0 : i32
    %c0_i32_0 = arith.constant 0 : i32
    %c0_i32_1 = arith.constant 0 : i32
    return %c0_i32, %c0_i32_0 : i32, i32
  }
  func.func @transform_5(%arg0: i32) -> (i32, i32) {
    %c0_i32 = arith.constant 0 : i32
    %c0_i32_0 = arith.constant 0 : i32
    %c0_i32_1 = arith.constant 0 : i32
    return %c0_i32, %c0_i32_0 : i32, i32
  }
  func.func @transform_6(%arg0: i32) -> (i32, i32) {
    %c0_i32 = arith.constant 0 : i32
    %c0_i32_0 = arith.constant 0 : i32
    %c0_i32_1 = arith.constant 0 : i32
    return %c0_i32, %c0_i32_0 : i32, i32
  }
  func.func @transform_7(%arg0: i32) -> (i32, i32) {
    %c0_i32 = arith.constant 0 : i32
    %c0_i32_0 = arith.constant 0 : i32
    return %arg0, %c0_i32 : i32, i32
  }
}

</mosaic_0001>

<bundles_post_ra>
// kernel: tpu_custom_call.1
= control target key start
LH: loop header
LB: loop body
LE: loop exit
PB: predicated region body
PF: predicated region fallthrough
CT: control target
= control target key end

     0   :  { %12 = vsyncpa [#allocation3], 0  ;;  %s831_s0 = inlined_call_operand.hbm [shape: bf16[16,128], index: 0, kind: input, shape index: {}]   ;;  %s832_s1 = inlined_call_operand.hbm [shape: bf16[128,128], index: 1, kind: input, shape index: {}]   ;;  %s833_s2 = inlined_call_operand.vmem [shape: f32[1,128], index: 2, kind: input, shape index: {}]   ;;  %s834_s3 = inlined_call_operand.hbm [shape: bf16[128,128], index: 3, kind: input, shape index: {}]   ;;  %s835_s4 = inlined_call_operand.vmem [shape: f32[1,128], index: 4, kind: input, shape index: {}]   ;;  %s836_s5 = inlined_call_operand.hbm [shape: bf16[128,128], index: 5, kind: input, shape index: {}]   ;;  %s837_s6 = inlined_call_operand.vmem [shape: f32[1,128], index: 6, kind: input, shape index: {}]   ;;  %s838_s7 = inlined_call_operand.hbm [shape: f32[16,128], index: 7, kind: output, shape index: {}]  }
   0x1   :  { %13 = vsyncpa [#allocation6], 0 }
   0x2   :  { %14 = vsyncpa [#allocation9], 0 }
   0x3   :  { %15 = vsyncpa [#allocation4], 0  ;;  %s714_s24 = smov [#allocation5]   ;;  %s715_s26 = smov [#allocation2]  }
   0x4   :  { %s33_s25 = sshll.u32 %s714_s24, 4  ;;  %s21_s27 = sshll.u32 %s715_s26, 4  ;;  %s34_s25 = int_to_ptr.vmem [resolvable:$true] %s33_s25  ;;  %s22_s27 = int_to_ptr.vmem [resolvable:$true] %s21_s27 }
   0x5   :  { %s614_s28 = scalar_lea.vmem %s34_s25, 1024  ;;  %p619_p1 = scmp.lt.s32.totalorder %s34_s25, %s34_s25 }
   0x6   :  { %p615_p0 = scmp.ne.s32.totalorder %s34_s25, %s614_s28  ;;  %p620_p2 = scmp.lt.s32.totalorder %s614_s28, %s614_s28 }
   0x8   :  { %p621_p3 = por %p620_p2, %p619_p1 }
   0xa   :  { %p622_p4 = pnand %p621_p3, %p615_p0 }
   0xc   :  { %625 = shalt.err (!%p622_p4)
}
   0xd   :  { %s716_s29 = smov 64   ;;  %s717_s30 = smov 4  }
   0xe   :  { %39 = dma.hbm_to_vmem [thread:$0]  %s832_s1, 1024, %s34_s25, [#allocation6], %s716_s29, %s716_s29, %s717_s30  }
   0xf   :  { %s634_s10 = scalar_lea.vmem %s22_s27, 128  ;;  %p639_p6 = scmp.lt.s32.totalorder %s22_s27, %s22_s27 }
  0x10   :  { %p635_p5 = scmp.ne.s32.totalorder %s22_s27, %s634_s10  ;;  %p640_p7 = scmp.lt.s32.totalorder %s634_s10, %s634_s10 }
  0x12   :  { %p641_p8 = por %p640_p7, %p639_p6 }
  0x14   :  { %p642_p9 = pnand %p641_p8, %p635_p5 }
  0x16   :  { %645 = shalt.err (!%p642_p9)
}
  0x17   :  { %27 = dma.hbm_to_vmem [thread:$0]  %s831_s0, 128, %s22_s27, [#allocation3], %s716_s29, %s716_s29, %s717_s30  }
  0x18   :  { %s718_s13 = smov [#allocation7]   ;;  %s719_s15 = smov [#allocation8]  }
  0x19   :  { %s47_s14 = sshll.u32 %s718_s13, 4  ;;  %s61_s16 = sshll.u32 %s719_s15, 4  ;;  %s48_s14 = int_to_ptr.vmem [resolvable:$true] %s47_s14  ;;  %s62_s16 = int_to_ptr.vmem [resolvable:$true] %s61_s16 }
  0x1a   :  { %s654_s1 = scalar_lea.vmem %s48_s14, 1024  ;;  %p659_p11 = scmp.lt.s32.totalorder %s48_s14, %s48_s14 }
  0x1b   :  { %p655_p10 = scmp.ne.s32.totalorder %s48_s14, %s654_s1  ;;  %p660_p12 = scmp.lt.s32.totalorder %s654_s1, %s654_s1 }
  0x1d   :  { %p661_p13 = por %p660_p12, %p659_p11 }
  0x1f   :  { %p662_p0 = pnand %p661_p13, %p655_p10 }
  0x21   :  { %665 = shalt.err (!%p662_p0)
}
  0x22   :  { %53 = dma.hbm_to_vmem [thread:$0]  %s834_s3, 1024, %s48_s14, [#allocation6], %s716_s29, %s716_s29, %s717_s30  }
  0x23   :  { %s674_s0 = scalar_lea.vmem %s62_s16, 1024  ;;  %p679_p2 = scmp.lt.s32.totalorder %s62_s16, %s62_s16 }
  0x24   :  { %p675_p1 = scmp.ne.s32.totalorder %s62_s16, %s674_s0  ;;  %p680_p3 = scmp.lt.s32.totalorder %s674_s0, %s674_s0 }
  0x26   :  { %p681_p4 = por %p680_p3, %p679_p2 }
  0x28   :  { %p682_p5 = pnand %p681_p4, %p675_p1 }
  0x2a   :  { %685 = shalt.err (!%p682_p5)
}
  0x2b   :  { %67 = dma.hbm_to_vmem [thread:$0]  %s836_s5, 1024, %s62_s16, [#allocation9], %s716_s29, %s716_s29, %s717_s30  }
  0x2c   :  { %706 = dma.done.wait [#allocation3], 128  }
  0x2d   :  { %707 = vsyncadd [#allocation3], 4294967168 }
  0x2e   :  { %708 = dma.done.wait [#allocation6], 2048  }
  0x2f   :  { %709 = vsyncadd [#allocation6], 4294965248 }
  0x30   :  { %710 = dma.done.wait [#allocation9], 1024  }
  0x31   :  { %711 = vsyncadd [#allocation9], 4294966272  ;;  %v720_v0 = vmov 0.0   ;;  %vm721_vm0 = vmmov 0   ;;  %v581_v1 = vld [vmem:[#allocation5 + $0x38] sm:$0xff]   ;;  %v582_v2 = vld [vmem:[#allocation5 + $0x30] sm:$0xff]  }
  0x32   :  { %510 = vmatprep.subr.bf16.mxu0 %v720_v0  ;;  %526 = vmatprep.mubr.msk.bf16.mxu0 %vm721_vm0, %v720_v0  ;;  %v583_v3 = vld [vmem:[#allocation5 + $0x28] sm:$0xff]   ;;  %v584_v4 = vld [vmem:[#allocation5 + $0x20] sm:$0xff]   ;;  %v591_v5 = vld [vmem:[#allocation7 + $0x38] sm:$0xff]   ;;  %s722_s24 = smov [#allocation10]  }
  0x33   :  { %530 = vmatprep.subr.bf16.mxu1 %v720_v0  ;;  %546 = vmatprep.mubr.msk.bf16.mxu1 %vm721_vm0, %v720_v0  ;;  %v593_v6 = vld [vmem:[#allocation7 + $0x30] sm:$0xff]   ;;  %v585_v7 = vld [vmem:[#allocation5 + $0x18] sm:$0xff]   ;;  %v595_v8 = vld [vmem:[#allocation7 + $0x28] sm:$0xff]   ;;  %s441_s25 = sshll.u32 %s722_s24, 4  ;;  %s442_s25 = int_to_ptr.vmem [resolvable:$true] %s441_s25 }
  0x34   :  { %511 = vmatpush3.bf16.msra.mxu0 %v581_v1  ;;  %531 = vmatpush3.bf16.msra.mxu1 %v591_v5  ;;  %v586_v9 = vld [vmem:[#allocation5 + $0x10] sm:$0xff]   ;;  %v587_v10 = vld [vmem:[#allocation5 + $0x8] sm:$0xff]   ;;  %v597_v11 = vld [vmem:[#allocation7 + $0x20] sm:$0xff]   ;;  %p691_p7 = scmp.lt.s32.totalorder %s442_s25, %s442_s25 }
  0x35   :  { %512 = vmatprep.subr.bf16.mxu0 %v720_v0  ;;  %532 = vmatprep.subr.bf16.mxu1 %v720_v0  ;;  %v599_v12 = vld [vmem:[#allocation7 + $0x18] sm:$0xff]   ;;  %v588_v13 = vld [vmem:[#allocation5] sm:$0xff]   ;;  %v592_v16 = vld [vmem:[#allocation8 + $0x30] sm:$0xff]  }
  0x36   :  { %v589_v14 = vld [vmem:[#allocation2] sm:$0xff]   ;;  %v594_v17 = vld [vmem:[#allocation8 + $0x28] sm:$0xff]   ;;  %v596_v18 = vld [vmem:[#allocation8 + $0x20] sm:$0xff]  }
  0x37   :  { %v590_v15 = vld [vmem:[#allocation8 + $0x38] sm:$0xff]   ;;  %v600_v20 = vld [vmem:[#allocation8 + $0x10] sm:$0xff]   ;;  %v602_v22 = vld [vmem:[#allocation8 + $0x8] sm:$0xff]  }
  0x38   :  { %513 = vmatpush3.bf16.msra.mxu0 %v582_v2  ;;  %533 = vmatpush3.bf16.msra.mxu1 %v593_v6  ;;  %v598_v19 = vld [vmem:[#allocation8 + $0x18] sm:$0xff]   ;;  %v601_v21 = vld [vmem:[#allocation7 + $0x10] sm:$0xff]   ;;  %v603_v23 = vld [vmem:[#allocation7 + $0x8] sm:$0xff]  }
  0x39   :  { %514 = vmatprep.subr.bf16.mxu0 %v720_v0  ;;  %534 = vmatprep.subr.bf16.mxu1 %v720_v0  ;;  %v604_v24 = vld [vmem:[#allocation8] sm:$0xff]   ;;  %v455_v26 = vld [vmem:[%s833_s2] ss:$0 sm:$0xff] }
  0x3a   :  { %v605_v25 = vld [vmem:[#allocation7] sm:$0xff]   ;;  %v474_v40 = vld [vmem:[%s837_s6] ss:$0 sm:$0xff]  ;;  %s686_s6 = scalar_lea.vmem %s442_s25, 256 }
  0x3b   :  { %v465_v41 = vld [vmem:[%s835_s4] ss:$0 sm:$0xff]  ;;  %p687_p6 = scmp.ne.s32.totalorder %s442_s25, %s686_s6  ;;  %p692_p8 = scmp.lt.s32.totalorder %s686_s6, %s686_s6 }
  0x3c   :  { %515 = vmatpush3.bf16.msra.mxu0 %v583_v3  ;;  %535 = vmatpush3.bf16.msra.mxu1 %v595_v8 }
  0x3d   :  { %516 = vmatprep.subr.bf16.mxu0 %v720_v0  ;;  %536 = vmatprep.subr.bf16.mxu1 %v720_v0  ;;  %p693_p9 = por %p692_p8, %p691_p7 }
  0x3f   :  { %p694_p10 = pnand %p693_p9, %p687_p6 }
  0x40   :  { %517 = vmatpush3.bf16.msra.mxu0 %v584_v4  ;;  %537 = vmatpush3.bf16.msra.mxu1 %v597_v11 }
  0x41   :  { %518 = vmatprep.subr.bf16.mxu0 %v720_v0  ;;  %538 = vmatprep.subr.bf16.mxu1 %v720_v0 }
  0x44   :  { %519 = vmatpush3.bf16.msra.mxu0 %v585_v7  ;;  %539 = vmatpush3.bf16.msra.mxu1 %v599_v12 }
  0x45   :  { %520 = vmatprep.subr.bf16.mxu0 %v720_v0  ;;  %540 = vmatprep.subr.bf16.mxu1 %v720_v0 }
  0x48   :  { %521 = vmatpush3.bf16.msra.mxu0 %v586_v9  ;;  %541 = vmatpush3.bf16.msra.mxu1 %v601_v21 }
  0x49   :  { %522 = vmatprep.subr.bf16.mxu0 %v720_v0  ;;  %542 = vmatprep.subr.bf16.mxu1 %v720_v0 }
  0x4c   :  { %523 = vmatpush3.bf16.msra.mxu0 %v587_v10  ;;  %543 = vmatpush3.bf16.msra.mxu1 %v603_v23 }
  0x4d   :  { %524 = vmatprep.subr.bf16.mxu0 %v720_v0  ;;  %544 = vmatprep.subr.bf16.mxu1 %v720_v0 }
  0x50   :  { %525 = vmatpush3.bf16.msra.mxu0 %v588_v13  ;;  %545 = vmatpush3.bf16.msra.mxu1 %v605_v25 }
  0x51   :  { %550 = vmatprep.subr.bf16.mxu0 %v720_v0 }
  0x53   :  { %527 = vmatmul.mubr.bf16.vlgmr.msra.gmra.mxu0 %v589_v14 }
  0x54   :  { %551 = vmatpush3.bf16.msra.mxu0 %v590_v15  ;;  %566 = vmatprep.mubr.msk.bf16.mxu0 %vm721_vm0, %v720_v0 }
  0x55   :  { %552 = vmatprep.subr.bf16.mxu0 %v720_v0 }
  0x58   :  { %553 = vmatpush3.bf16.msra.mxu0 %v592_v16 }
  0x59   :  { %554 = vmatprep.subr.bf16.mxu0 %v720_v0 }
  0x5c   :  { %555 = vmatpush3.bf16.msra.mxu0 %v594_v17 }
  0x5d   :  { %556 = vmatprep.subr.bf16.mxu0 %v720_v0 }
  0x60   :  { %557 = vmatpush3.bf16.msra.mxu0 %v596_v18 }
  0x61   :  { %558 = vmatprep.subr.bf16.mxu0 %v720_v0 }
  0x64   :  { %559 = vmatpush3.bf16.msra.mxu0 %v598_v19 }
  0x65   :  { %560 = vmatprep.subr.bf16.mxu0 %v720_v0 }
  0x68   :  { %561 = vmatpush3.bf16.msra.mxu0 %v600_v20 }
  0x69   :  { %562 = vmatprep.subr.bf16.mxu0 %v720_v0 }
  0x6c   :  { %563 = vmatpush3.bf16.msra.mxu0 %v602_v22 }
  0x6d   :  { %564 = vmatprep.subr.bf16.mxu0 %v720_v0 }
  0x70   :  { %565 = vmatpush3.bf16.msra.mxu0 %v604_v24 }
  0x73   :  { %567 = vmatmul.mubr.bf16.vlgmr.msra.gmra.mxu0 %v589_v14 }
 0x113   :  { %v196_v27 = vpop.f32.mrf.mxu0 }
 0x114   :  { %v197_v29 = vadd.f32 %v455_v26, %v196_v27 }
 0x115   :  { %v528_v28 = vpop.f32.mrf.mxu0 }
 0x116   :  { %v203_v33 = vmax.f32 %v197_v29, 0.0 }
 0x117   :  { %v199_v30 = vpop.f32.mrf.mxu0 }
 0x118   :  { %v200_v31 = vadd.f32 %v455_v26, %v199_v30 }
 0x119   :  { %v529_v32 = vpop.f32.mrf.mxu0 }
 0x11a   :  { %v204_v34 = vmax.f32 %v200_v31, 0.0 }
 0x11c   :  { %v205_v35 = vpack.c.bf16 %v204_v34, %v203_v33 }
 0x11e   :  { %547 = vmatmul.mubr.bf16.vlgmr.msra.gmra.mxu1 %v205_v35 }
 0x133   :  { %v425_v36 = vpop.f32.mrf.mxu0 }
 0x134   :  { %v426_v43 = vadd.f32 %v474_v40, %v425_v36 }
 0x135   :  { %v568_v37 = vpop.f32.mrf.mxu0 }
 0x137   :  { %v428_v38 = vpop.f32.mrf.mxu0 }
 0x138   :  { %v429_v51 = vadd.f32 %v474_v40, %v428_v38 }
 0x139   :  { %v569_v39 = vpop.f32.mrf.mxu0 }
 0x1de   :  { %v311_v42 = vpop.f32.mrf.mxu1 }
 0x1df   :  { %v312_v44 = vadd.f32 %v465_v41, %v311_v42 }
 0x1e0   :  { %v548_v45 = vpop.f32.mrf.mxu1 }
 0x1e1   :  { %v318_v46 = vmax.f32 %v312_v44, 0.0 }
 0x1e2   :  { %v314_v47 = vpop.f32.mrf.mxu1 }
 0x1e3   :  { %v432_v48 = vadd.f32 %v426_v43, %v318_v46  ;;  %v315_v49 = vadd.f32 %v465_v41, %v314_v47 }
 0x1e4   :  { %v549_v50 = vpop.f32.mrf.mxu1 }
 0x1e5   :  { %434 = vst [vmem:[#allocation10] sm:$0xff] %v432_v48  ;;  %v319_v52 = vmax.f32 %v315_v49, 0.0 }
 0x1e7   :  { %v433_v53 = vadd.f32 %v429_v51, %v319_v52 }
 0x1e9   :  { %435 = vst [vmem:[#allocation10 + $0x8] sm:$0xff] %v433_v53 }
 0x1ea   :  { %697 = shalt.err (!%p694_p10)
}
 0x1eb   :  { %s723_s4 = smov 128   ;;  %s724_s26 = smov 8  }
 0x1ec   :  { %447 = dma.vmem_to_hbm [thread:$0]  %s442_s25, 256, %s838_s7, [#allocation4], %s723_s4, %s723_s4, %s724_s26  }
 0x1ed   :  { %712 = dma.done.wait [#allocation4], 256  }
 0x1ee   :  { %713 = vsyncadd [#allocation4], 4294967040 }
 0x1ef   :  { %451 = vsyncpa [#allocation3], 1 }
 0x1f0   :  { %452 = vsyncpa [#allocation6], 1 }
 0x1f1   :  { %453 = vsyncpa [#allocation9], 1 }
 0x1f2   :  { %454 = vsyncpa [#allocation4], 1 }

</bundles_post_ra>
